<compile_context>
chip_gen: v6e
topology: v6e:2x2x1
jax: 0.10.0
libtpu: 0.0.40
codegen_flags: <defaults>
</compile_context>

<pallas_src>
import jax
import jax.numpy as jnp
import numpy as np
from jax.experimental import pallas as pl
from jax.experimental.pallas import tpu as pltpu

# ----------------------------- configuration -------------------------------
EMBED_DIM = 128          # args.transformer_embedding_dim
ENC_DIM = 384            # encoder_dim (fixed in the module)
SIZE = (32, 32)          # args.input_size (H, W)
STRIDE = 8               # args.stride  (4 or 8)
H_PRIME = SIZE[0] // STRIDE
W_PRIME = SIZE[1] // STRIDE
P = H_PRIME * W_PRIME
K_PATCH = 3 * STRIDE * STRIDE   # raw pixels per patch (stub patch-embed input)
K_PAD = 256                     # K padded to 2 full lane registers

IMAGENET_MEAN = np.array([0.485, 0.456, 0.406], dtype=np.float32)
IMAGENET_STD = np.array([0.229, 0.224, 0.225], dtype=np.float32)


def _round_up(x, m):
    return (x + m - 1) // m * m


# ------------------------------ Pallas kernel ------------------------------
def backbone_kernel(x_ref, w_ref, b_ref, pos_ref, out_ref):
    """One M-tile (TILE_M token rows, spanning frames) per grid step.

    x_ref   : (TILE_M, K_PAD)     bf16 raw pixel patches, K zero-padded
                                  (normalization folded into w/b)
    w_ref   : (K_PAD, EMBED_DIM)  bf16 fused weight (norm + encoder + 1x1 proj)
    b_ref   : (1, EMBED_DIM)      f32  fused bias
    pos_ref : (TILE_M, EMBED_DIM) f32  per-row frame positional embedding
    out_ref : (TILE_M, EMBED_DIM) f32  projected tokens
    """
    t = jnp.dot(x_ref[...], w_ref[...], preferred_element_type=jnp.float32)
    out_ref[...] = t + b_ref[...] + pos_ref[...]


def run_backbone_kernel(x, w_fused, b_fused, pos_rows, tile_m):
    """x: (M_pad, K_PAD) bf16, pos_rows: (M_pad, EMBED_DIM) f32."""
    m_pad = x.shape[0]
    grid = (m_pad // tile_m,)
    return pl.pallas_call(
        backbone_kernel,
        out_shape=jax.ShapeDtypeStruct((m_pad, EMBED_DIM), jnp.float32),
        grid=grid,
        in_specs=[
            pl.BlockSpec((tile_m, K_PAD), lambda i: (i, 0)),
            pl.BlockSpec((K_PAD, EMBED_DIM), lambda i: (0, 0)),
            pl.BlockSpec((1, EMBED_DIM), lambda i: (0, 0)),
            pl.BlockSpec((tile_m, EMBED_DIM), lambda i: (i, 0)),
        ],
        out_specs=pl.BlockSpec((tile_m, EMBED_DIM), lambda i: (i, 0)),
        compiler_params=pltpu.CompilerParams(
            dimension_semantics=("parallel",)),
    )(x, w_fused, b_fused, pos_rows)


# ------------------------------- glue (JAX) --------------------------------
def make_params(key):
    k1, k2, k3, k4, k5 = jax.random.split(key, 5)
    w_enc = (jax.random.normal(k1, (K_PATCH, ENC_DIM), jnp.float32)
             * (1.0 / np.sqrt(K_PATCH)))
    b_enc = jax.random.normal(k2, (1, ENC_DIM), jnp.float32) * 0.01
    # Conv2d(384, D, kernel_size=1) weight (D, 384, 1, 1) -> (384, D) matmul form
    w_proj = (jax.random.normal(k3, (ENC_DIM, EMBED_DIM), jnp.float32)
              * (1.0 / np.sqrt(ENC_DIM)))
    b_proj = jax.random.normal(k4, (1, EMBED_DIM), jnp.float32) * 0.01
    # frame_pos_embedding: trunc_normal(std=0.02), stored channel-last (P, D)
    pos = (jax.random.truncated_normal(k5, -2.0, 2.0, (P, EMBED_DIM),
                                       jnp.float32) * 0.02)

    # per-input-element normalization constants (channel innermost, matches
    # the _patchify layout)
    mean_vec = jnp.tile(jnp.asarray(IMAGENET_MEAN), STRIDE * STRIDE)       # (K,)
    stdinv_vec = jnp.tile(1.0 / jnp.asarray(IMAGENET_STD), STRIDE * STRIDE)

    # Fold (x/255 - mean) * stdinv into the first matmul, then fuse the two
    # linear layers.  Exactly equivalent today (linear encoder stub only).
    w_norm = w_enc * (stdinv_vec / 255.0)[:, None]                # diag scale
    b_norm = b_enc - (mean_vec * stdinv_vec)[None, :] @ w_enc
    w_fused = w_norm @ w_proj                                     # (K_PATCH, D)
    b_fused = b_norm @ w_proj + b_proj                            # (1, D)

    w_fused = jnp.pad(w_fused, ((0, K_PAD - K_PATCH), (0, 0)))
    w_fused = w_fused.astype(jnp.bfloat16)
    return dict(w_fused=w_fused, b_fused=b_fused, pos=pos)


def _patchify(frames_nhwc):
    """(BT, Hs, Ws, 3) -> (BT, P, 3*stride*stride), channel innermost."""
    bt = frames_nhwc.shape[0]
    x = frames_nhwc.reshape(bt, H_PRIME, STRIDE, W_PRIME, STRIDE, 3)
    x = jnp.transpose(x, (0, 1, 3, 2, 4, 5))
    return x.reshape(bt, P, K_PATCH)


def _get_query_tokens(tokens, queries):
    """F.grid_sample(mode='bilinear', padding_mode='border',
    align_corners=False) at single points, on channel-last features."""
    B, T, _, D = tokens.shape
    N = queries.shape[1]
    feat = tokens.reshape(B, T, H_PRIME, W_PRIME, D)

    t_idx = queries[:, :, 0].astype(jnp.int32)              # (B, N)
    x = queries[:, :, 1]
    y = queries[:, :, 2]
    xg = x / SIZE[1] * 2.0 - 1.0
    yg = y / SIZE[0] * 2.0 - 1.0
    # align_corners=False unnormalization, then border clipping
    ix = jnp.clip(((xg + 1.0) * W_PRIME - 1.0) * 0.5, 0.0, W_PRIME - 1.0)
    iy = jnp.clip(((yg + 1.0) * H_PRIME - 1.0) * 0.5, 0.0, H_PRIME - 1.0)
    ix0 = jnp.floor(ix)
    iy0 = jnp.floor(iy)
    wx1 = ix - ix0
    wy1 = iy - iy0
    wx0 = 1.0 - wx1
    wy0 = 1.0 - wy1
    ix0i = ix0.astype(jnp.int32)
    iy0i = iy0.astype(jnp.int32)
    ix1i = jnp.clip(ix0i + 1, 0, W_PRIME - 1)
    iy1i = jnp.clip(iy0i + 1, 0, H_PRIME - 1)

    bb = jnp.broadcast_to(jnp.arange(B)[:, None], (B, N))

    def gather(iy_, ix_):
        return feat[bb, t_idx, iy_, ix_]                     # (B, N, D)

    q = (gather(iy0i, ix0i) * (wy0 * wx0)[..., None]
         + gather(iy0i, ix1i) * (wy0 * wx1)[..., None]
         + gather(iy1i, ix0i) * (wy1 * wx0)[..., None]
         + gather(iy1i, ix1i) * (wy1 * wx1)[..., None])
    return q


def backbone_forward(video, queries, params):
    """video: (B, T, 3, H, W) float32 in [0, 255]  (NCHW per frame, PyTorch
    convention).  queries: (B, N, 3) as (t, x, y) with x/y in input_size
    pixel coordinates.  Returns (tokens (B,T,P,D), q (B,N,D))."""
    B, T, C, H, W = video.shape
    N = queries.shape[1]
    BT = B * T

    # view(B*T, C, H, W), NCHW -> NHWC
    frames = video.reshape(BT, C, H, W)
    frames = jnp.transpose(frames, (0, 2, 3, 1))             # (BT, H, W, 3)

    # F.interpolate(size=self.size, mode='bilinear', align_corners=False)
    # (half-pixel centers, no antialias — matches PyTorch defaults)
    frames = jax.image.resize(frames, (BT, SIZE[0], SIZE[1], 3),
                              method="bilinear", antialias=False)

    # bf16 activations from here on: halves HBM traffic of the patchify
    # transpose and feeds the bf16-native MXU; normalization is folded into
    # the fused weight so raw pixel values go straight into the matmul.
    frames = frames.astype(jnp.bfloat16)
    patches = _patchify(frames)                              # (BT, P, K) bf16

    # flatten all frames into one (M, K) matrix and pad K 192 -> 256
    M = BT * P
    x = patches.reshape(M, K_PATCH)
    x = jnp.pad(x, ((0, 0), (0, K_PAD - K_PATCH)))

    # per-row positional embedding (replicated per frame; only a few KiB)
    pos_rows = jnp.broadcast_to(params["pos"][None], (BT, P, EMBED_DIM))
    pos_rows = pos_rows.reshape(M, EMBED_DIM)

    # M-tile: as large as possible (<=512), sublane-aligned; pad M to a
    # multiple of the tile so every grid step sees a full block.
    tile_m = min(512, _round_up(M, 8))
    m_pad = _round_up(M, tile_m)
    if m_pad != M:
        x = jnp.pad(x, ((0, m_pad - M), (0, 0)))
        pos_rows = jnp.pad(pos_rows, ((0, m_pad - M), (0, 0)))

    out = run_backbone_kernel(x, params["w_fused"], params["b_fused"],
                              pos_rows, tile_m)              # (m_pad, D) f32

    tokens = out[:M].reshape(B, T, P, EMBED_DIM)
    q = _get_query_tokens(tokens, queries)

    assert tokens.shape == (B, T, P, EMBED_DIM)
    assert q.shape == (B, N, EMBED_DIM)
    return tokens, q


# --------------------------------- driver ----------------------------------
if __name__ == "__main__":
    key = jax.random.PRNGKey(0)
    k_params, k_video, k_t, k_xy = jax.random.split(key, 4)

    params = make_params(k_params)

    B, T, N = 2, 2, 8
    H_in, W_in = 48, 48
    video = jax.random.uniform(k_video, (B, T, 3, H_in, W_in),
                               jnp.float32, 0.0, 255.0)
    q_t = jax.random.randint(k_t, (B, N, 1), 0, T).astype(jnp.float32)
    q_xy = jax.random.uniform(k_xy, (B, N, 2), jnp.float32,
                              0.0, float(SIZE[1]))
    queries = jnp.concatenate([q_t, q_xy], axis=-1)          # (B, N, 3)

    tokens, q = backbone_forward(video, queries, params)
    jax.block_until_ready((tokens, q))

    assert tokens.shape == (B, T, P, EMBED_DIM)
    assert q.shape == (B, N, EMBED_DIM)
    print("KERNEL_OK")
</pallas_src>

<mosaic_0001>
module attributes {stable_mosaic.version = 11 : i64} {
  func.func @backbone_kernel(%arg0: i32, %arg1: memref<64x256xbf16, #tpu.memory_space<vmem>>, %arg2: memref<256x128xbf16, #tpu.memory_space<vmem>>, %arg3: memref<1x128xf32, #tpu.memory_space<vmem>>, %arg4: memref<64x128xf32, #tpu.memory_space<vmem>>, %arg5: memref<64x128xf32, #tpu.memory_space<vmem>>) attributes {dimension_semantics = [#tpu.dimension_semantics<parallel>], iteration_bounds = array<i64: 1>, scalar_prefetch = 0 : i64, scratch_operands = 0 : i64, tpu.core_type = #tpu.core_type<tc>, window_params = [{transform_indices = @transform_0, window_bounds = array<i64: 64, 256>}, {pipeline_mode = #tpu.pipeline_mode<synchronous>, transform_indices = @transform_1, window_bounds = array<i64: 256, 128>}, {pipeline_mode = #tpu.pipeline_mode<synchronous>, transform_indices = @transform_2, window_bounds = array<i64: 1, 128>}, {transform_indices = @transform_3, window_bounds = array<i64: 64, 128>}, {transform_indices = @transform_4, window_bounds = array<i64: 64, 128>}]} {
    %c0 = arith.constant 0 : index
    %c0_0 = arith.constant 0 : index
    %0 = vector.load %arg1[%c0, %c0_0] : memref<64x256xbf16, #tpu.memory_space<vmem>>, vector<64x256xbf16>
    %c0_1 = arith.constant 0 : index
    %c0_2 = arith.constant 0 : index
    %1 = vector.load %arg2[%c0_1, %c0_2] : memref<256x128xbf16, #tpu.memory_space<vmem>>, vector<256x128xbf16>
    %cst = arith.constant dense<0.000000e+00> : vector<64x128xf32>
    %2 = tpu.matmul %0, %1, %cst {dimension_numbers = #tpu.dot_dimension_numbers<[1], [0], [0], [1], [0, 0, 1, 1], [], []>} : vector<64x256xbf16>, vector<256x128xbf16>, vector<64x128xf32> -> vector<64x128xf32>
    %c0_3 = arith.constant 0 : index
    %c0_4 = arith.constant 0 : index
    %3 = vector.load %arg3[%c0_3, %c0_4] : memref<1x128xf32, #tpu.memory_space<vmem>>, vector<1x128xf32>
    %4 = vector.broadcast %3 : vector<1x128xf32> to vector<64x128xf32>
    %5 = arith.addf %2, %4 : vector<64x128xf32>
    %c0_5 = arith.constant 0 : index
    %c0_6 = arith.constant 0 : index
    %6 = vector.load %arg4[%c0_5, %c0_6] : memref<64x128xf32, #tpu.memory_space<vmem>>, vector<64x128xf32>
    %7 = arith.addf %5, %6 : vector<64x128xf32>
    %c0_7 = arith.constant 0 : index
    %c0_8 = arith.constant 0 : index
    %8 = vector.load %arg5[%c0_7, %c0_8] : memref<64x128xf32, #tpu.memory_space<vmem>>, vector<64x128xf32>
    tpu.vector_store %arg5[%c0_7, %c0_8], %7 {strides = array<i32>} : memref<64x128xf32, #tpu.memory_space<vmem>>, vector<64x128xf32>,
    return
  }
  func.func @transform_0(%arg0: i32) -> (i32, i32) {
    %c0_i32 = arith.constant 0 : i32
    %c0_i32_0 = arith.constant 0 : i32
    return %arg0, %c0_i32 : i32, i32
  }
  func.func @transform_1(%arg0: i32) -> (i32, i32) {
    %c0_i32 = arith.constant 0 : i32
    %c0_i32_0 = arith.constant 0 : i32
    %c0_i32_1 = arith.constant 0 : i32
    return %c0_i32, %c0_i32_0 : i32, i32
  }
  func.func @transform_2(%arg0: i32) -> (i32, i32) {
    %c0_i32 = arith.constant 0 : i32
    %c0_i32_0 = arith.constant 0 : i32
    %c0_i32_1 = arith.constant 0 : i32
    return %c0_i32, %c0_i32_0 : i32, i32
  }
  func.func @transform_3(%arg0: i32) -> (i32, i32) {
    %c0_i32 = arith.constant 0 : i32
    %c0_i32_0 = arith.constant 0 : i32
    return %arg0, %c0_i32 : i32, i32
  }
  func.func @transform_4(%arg0: i32) -> (i32, i32) {
    %c0_i32 = arith.constant 0 : i32
    %c0_i32_0 = arith.constant 0 : i32
    return %arg0, %c0_i32 : i32, i32
  }
}

</mosaic_0001>

<bundles_post_ra>
// kernel: tpu_custom_call.1
= control target key start
LH: loop header
LB: loop body
LE: loop exit
PB: predicated region body
PF: predicated region fallthrough
CT: control target
= control target key end

     0   :  { %9 = vsyncpa [#allocation3], 0  ;;  %s610_s0 = inlined_call_operand.hbm [shape: bf16[64,256], index: 0, kind: input, shape index: {}]   ;;  %s611_s1 = inlined_call_operand.hbm [shape: bf16[256,128], index: 1, kind: input, shape index: {}]   ;;  %s612_s2 = inlined_call_operand.vmem [shape: f32[1,128], index: 2, kind: input, shape index: {}]   ;;  %s613_s3 = inlined_call_operand.hbm [shape: f32[64,128], index: 3, kind: input, shape index: {}]   ;;  %s614_s4 = inlined_call_operand.hbm [shape: f32[64,128], index: 4, kind: output, shape index: {}]  }
   0x1   :  { %10 = vsyncpa [#allocation6], 0 }
   0x2   :  { %11 = vsyncpa [#allocation4], 0  ;;  %s553_s15 = smov [#allocation5]  }
   0x3   :  { %s29_s16 = sshll.u32 %s553_s15, 4  ;;  %s30_s16 = int_to_ptr.vmem [resolvable:$true] %s29_s16 }
   0x4   :  { %s475_s17 = scalar_lea.vmem %s30_s16, 2048  ;;  %p480_p1 = scmp.lt.s32.totalorder %s30_s16, %s30_s16 }
   0x5   :  { %p476_p0 = scmp.ne.s32.totalorder %s30_s16, %s475_s17  ;;  %p481_p2 = scmp.lt.s32.totalorder %s475_s17, %s475_s17 }
   0x7   :  { %p482_p3 = por %p481_p2, %p480_p1 }
   0x9   :  { %p483_p4 = pnand %p482_p3, %p476_p0 }
   0xb   :  { %486 = shalt.err (!%p483_p4)
}
   0xc   :  { %s554_s18 = smov 64   ;;  %s555_s19 = smov 4  }
   0xd   :  { %35 = dma.hbm_to_vmem [thread:$0]  %s611_s1, 2048, %s30_s16, [#allocation6], %s554_s18, %s554_s18, %s555_s19  }
   0xe   :  { %s556_s22 = smov [#allocation2]  }
   0xf   :  { %s17_s23 = sshll.u32 %s556_s22, 4  ;;  %s18_s23 = int_to_ptr.vmem [resolvable:$true] %s17_s23 }
  0x10   :  { %s495_s24 = scalar_lea.vmem %s18_s23, 1024  ;;  %p500_p6 = scmp.lt.s32.totalorder %s18_s23, %s18_s23 }
  0x11   :  { %p496_p5 = scmp.ne.s32.totalorder %s18_s23, %s495_s24  ;;  %p501_p7 = scmp.lt.s32.totalorder %s495_s24, %s495_s24 }
  0x13   :  { %p502_p8 = por %p501_p7, %p500_p6 }
  0x15   :  { %p503_p9 = pnand %p502_p8, %p496_p5 }
  0x17   :  { %506 = shalt.err (!%p503_p9)
}
  0x18   :  { %s557_s25 = smov 128   ;;  %s558_s26 = smov 8  }
  0x19   :  { %23 = dma.hbm_to_vmem [thread:$0]  %s610_s0, 1024, %s18_s23, [#allocation3], %s557_s25, %s557_s25, %s558_s26  }
  0x1a   :  { %s559_s1 = smov [#allocation7]  }
  0x1b   :  { %s43_s29 = sshll.u32 %s559_s1, 4  ;;  %s44_s29 = int_to_ptr.vmem [resolvable:$true] %s43_s29 }
  0x1c   :  { %s515_s30 = scalar_lea.vmem %s44_s29, 1024  ;;  %p520_p11 = scmp.lt.s32.totalorder %s44_s29, %s44_s29 }
  0x1d   :  { %p516_p10 = scmp.ne.s32.totalorder %s44_s29, %s515_s30  ;;  %p521_p12 = scmp.lt.s32.totalorder %s515_s30, %s515_s30 }
  0x1f   :  { %p522_p13 = por %p521_p12, %p520_p11 }
  0x21   :  { %p523_p0 = pnand %p522_p13, %p516_p10 }
  0x23   :  { %526 = shalt.err (!%p523_p0)
}
  0x24   :  { %49 = dma.hbm_to_vmem [thread:$0]  %s613_s3, 1024, %s44_s29, [#allocation6], %s557_s25, %s557_s25, %s558_s26  }
  0x25   :  { %547 = dma.done.wait [#allocation3], 1024  }
  0x26   :  { %548 = vsyncadd [#allocation3], 4294966272 }
  0x27   :  { %549 = dma.done.wait [#allocation6], 3072  }
  0x28   :  { %550 = vsyncadd [#allocation6], 4294964224  ;;  %v439_v0 = vld [vmem:[#allocation5 + $0x78] sm:$0xff]   ;;  %v441_v2 = vld [vmem:[#allocation5 + $0x70] sm:$0xff]  }
  0x29   :  { %v440_v1 = vld [vmem:[#allocation5 + $0x38] sm:$0xff]   ;;  %375 = vmatprep.subr.bf16.mxu0 %v439_v0  ;;  %415 = vmatprep.subr.bf16.mxu1 %v439_v0  ;;  %v442_v3 = vld [vmem:[#allocation5 + $0x30] sm:$0xff]   ;;  %v443_v4 = vld [vmem:[#allocation5 + $0x68] sm:$0xff]  }
  0x2a   :  { %376 = vmatpush3.bf16.msra.mxu0 %v440_v1  ;;  %423 = vmatpush3.bf16.msra.mxu1 %v440_v1  ;;  %v444_v5 = vld [vmem:[#allocation5 + $0x28] sm:$0xff]   ;;  %v445_v6 = vld [vmem:[#allocation5 + $0x60] sm:$0xff]   ;;  %v447_v8 = vld [vmem:[#allocation5 + $0x58] sm:$0xff]  }
  0x2b   :  { %377 = vmatprep.subr.bf16.mxu0 %v441_v2  ;;  %416 = vmatprep.subr.bf16.mxu1 %v441_v2  ;;  %v446_v7 = vld [vmem:[#allocation5 + $0x20] sm:$0xff]   ;;  %v448_v9 = vld [vmem:[#allocation5 + $0x18] sm:$0xff]   ;;  %v449_v10 = vld [vmem:[#allocation5 + $0x50] sm:$0xff]  }
  0x2c   :  { %v457_v11 = vld [vmem:[#allocation2 + $0x4] ss:$8 sps:$4 sm:$0xff]   ;;  %v450_v13 = vld [vmem:[#allocation5 + $0x10] sm:$0xff]   ;;  %v455_v18 = vld [vmem:[#allocation2] ss:$8 sps:$4 sm:$0xff]  }
  0x2d   :  { %v460_v12 = vld [vmem:[#allocation2 + $0x24] ss:$8 sps:$4 sm:$0xff]   ;;  %275 = vmatprep.mubr.bf16.mxu0 %v457_v11  ;;  %v458_v19 = vld [vmem:[#allocation2 + $0x20] ss:$8 sps:$4 sm:$0xff]   ;;  %v461_v20 = vld [vmem:[#allocation2 + $0x14] ss:$8 sps:$4 sm:$0xff]  }
  0x2e   :  { %378 = vmatpush3.bf16.msra.mxu0 %v442_v3  ;;  %424 = vmatpush3.bf16.msra.mxu1 %v442_v3  ;;  %v451_v14 = vld [vmem:[#allocation5 + $0x48] sm:$0xff]   ;;  %v453_v16 = vld [vmem:[#allocation5 + $0x40] sm:$0xff]   ;;  %v463_v21 = vld [vmem:[#allocation2 + $0x34] ss:$8 sps:$4 sm:$0xff]  }
  0x2f   :  { %379 = vmatprep.subr.bf16.mxu0 %v443_v4  ;;  %417 = vmatprep.subr.bf16.mxu1 %v443_v4  ;;  %v452_v15 = vld [vmem:[#allocation5 + $0x8] sm:$0xff]   ;;  %v454_v17 = vld [vmem:[#allocation5] sm:$0xff]   ;;  %v465_v22 = vld [vmem:[#allocation2 + $0x10] ss:$8 sps:$4 sm:$0xff]  }
  0x30   :  { %291 = vmatprep.mubr.bf16.mxu1 %v460_v12  ;;  %v466_v23 = vld [vmem:[#allocation2 + $0x30] ss:$8 sps:$4 sm:$0xff]   ;;  %v350_v26 = vld [vmem:[%s612_s2] ss:$0 sm:$0xff]  ;;  %v309_v43 = vld [vmem:[#allocation7 + $0x8] sm:$0xff]  ;;  %s560_s2 = smov [#allocation8]  }
  0x31   :  { %v308_v31 = vld [vmem:[#allocation7] sm:$0xff]  ;;  %v313_v44 = vld [vmem:[#allocation7 + $0x28] sm:$0xff]  ;;  %v310_v55 = vld [vmem:[#allocation7 + $0x10] sm:$0xff]  ;;  %s337_s7 = sshll.u32 %s560_s2, 4  ;;  %s338_s7 = int_to_ptr.vmem [resolvable:$true] %s337_s7 }
  0x32   :  { %380 = vmatpush3.bf16.msra.mxu0 %v444_v5  ;;  %425 = vmatpush3.bf16.msra.mxu1 %v444_v5  ;;  %v312_v32 = vld [vmem:[#allocation7 + $0x20] sm:$0xff]  ;;  %v314_v56 = vld [vmem:[#allocation7 + $0x30] sm:$0xff]  ;;  %v311_v3 = vld [vmem:[#allocation7 + $0x18] sm:$0xff]  ;;  %s527_s8 = scalar_lea.vmem %s338_s7, 1024  ;;  %p532_p2 = scmp.lt.s32.totalorder %s338_s7, %s338_s7 }
  0x33   :  { %381 = vmatprep.subr.bf16.mxu0 %v445_v6  ;;  %418 = vmatprep.subr.bf16.mxu1 %v445_v6  ;;  %v315_v4 = vld [vmem:[#allocation7 + $0x38] sm:$0xff]  ;;  %p528_p1 = scmp.ne.s32.totalorder %s338_s7, %s527_s8  ;;  %p533_p3 = scmp.lt.s32.totalorder %s527_s8, %s527_s8 }
  0x35   :  { %p534_p4 = por %p533_p3, %p532_p2 }
  0x36   :  { %382 = vmatpush3.bf16.msra.mxu0 %v446_v7  ;;  %426 = vmatpush3.bf16.msra.mxu1 %v446_v7 }
  0x37   :  { %383 = vmatprep.subr.bf16.mxu0 %v447_v8  ;;  %419 = vmatprep.subr.bf16.mxu1 %v447_v8  ;;  %p535_p5 = pnand %p534_p4, %p528_p1 }
  0x3a   :  { %384 = vmatpush3.bf16.msra.mxu0 %v448_v9  ;;  %427 = vmatpush3.bf16.msra.mxu1 %v448_v9 }
  0x3b   :  { %385 = vmatprep.subr.bf16.mxu0 %v449_v10  ;;  %420 = vmatprep.subr.bf16.mxu1 %v449_v10 }
  0x3e   :  { %386 = vmatpush3.bf16.msra.mxu0 %v450_v13  ;;  %428 = vmatpush3.bf16.msra.mxu1 %v450_v13 }
  0x3f   :  { %387 = vmatprep.subr.bf16.mxu0 %v451_v14  ;;  %421 = vmatprep.subr.bf16.mxu1 %v451_v14 }
  0x42   :  { %388 = vmatpush3.bf16.msra.mxu0 %v452_v15  ;;  %429 = vmatpush3.bf16.msra.mxu1 %v452_v15 }
  0x43   :  { %389 = vmatprep.subr.bf16.mxu0 %v453_v16  ;;  %422 = vmatprep.subr.bf16.mxu1 %v453_v16 }
  0x46   :  { %390 = vmatpush3.bf16.msra.mxu0 %v454_v17  ;;  %430 = vmatpush3.bf16.msra.mxu1 %v454_v17 }
  0x49   :  { %276 = vmatmul.mubr.bf16.vlgmr.msra.gmra.mxu0 %v455_v18  ;;  %292 = vmatmul.mubr.bf16.vlgmr.msra.gmra.mxu1 %v458_v19 }
  0x4a   :  { %283 = vmatprep.mubr.bf16.mxu0 %v461_v20  ;;  %299 = vmatprep.mubr.bf16.mxu1 %v463_v21 }
  0x51   :  { %284 = vmatmul.mubr.bf16.gmra.mxu0 %v465_v22  ;;  %300 = vmatmul.mubr.bf16.gmra.mxu1 %v466_v23 }
 0x109   :  { %v391_v24 = vpop.f32.mrf.mxu0  ;;  %v403_v25 = vpop.f32.mrf.mxu1 }
 0x10b   :  { %v392_v27 = vpop.f32.mrf.mxu0  ;;  %v404_v28 = vpop.f32.mrf.mxu1 }
 0x10c   :  { %v393_v29 = vadd.f32 %v392_v27, %v391_v24  ;;  %v405_v30 = vadd.f32 %v404_v28, %v403_v25 }
 0x10d   :  { %v394_v33 = vpop.f32.mrf.mxu0  ;;  %v406_v34 = vpop.f32.mrf.mxu1 }
 0x10e   :  { %v278_v35 = vadd.f32 %v393_v29, %v350_v26  ;;  %v294_v36 = vadd.f32 %v405_v30, %v350_v26 }
 0x10f   :  { %v395_v37 = vpop.f32.mrf.mxu0  ;;  %v407_v38 = vpop.f32.mrf.mxu1 }
 0x110   :  { %v316_v39 = vadd.f32 %v308_v31, %v278_v35  ;;  %v320_v40 = vadd.f32 %v312_v32, %v294_v36  ;;  %v396_v41 = vadd.f32 %v395_v37, %v394_v33  ;;  %v408_v42 = vadd.f32 %v407_v38, %v406_v34 }
 0x111   :  { %v397_v45 = vpop.f32.mrf.mxu0  ;;  %v409_v46 = vpop.f32.mrf.mxu1 }
 0x112   :  { %324 = vst [vmem:[#allocation8] sm:$0xff] %v316_v39  ;;  %328 = vst [vmem:[#allocation8 + $0x20] sm:$0xff] %v320_v40  ;;  %v281_v47 = vadd.f32 %v396_v41, %v350_v26  ;;  %v297_v48 = vadd.f32 %v408_v42, %v350_v26 }
 0x113   :  { %v398_v49 = vpop.f32.mrf.mxu0  ;;  %v410_v50 = vpop.f32.mrf.mxu1 }
 0x114   :  { %v317_v51 = vadd.f32 %v309_v43, %v281_v47  ;;  %v321_v52 = vadd.f32 %v313_v44, %v297_v48  ;;  %v399_v53 = vadd.f32 %v398_v49, %v397_v45  ;;  %v411_v54 = vadd.f32 %v410_v50, %v409_v46 }
 0x115   :  { %v400_v57 = vpop.f32.mrf.mxu0  ;;  %v412_v58 = vpop.f32.mrf.mxu1 }
 0x116   :  { %325 = vst [vmem:[#allocation8 + $0x8] sm:$0xff] %v317_v51  ;;  %329 = vst [vmem:[#allocation8 + $0x28] sm:$0xff] %v321_v52  ;;  %v286_v59 = vadd.f32 %v399_v53, %v350_v26  ;;  %v302_v60 = vadd.f32 %v411_v54, %v350_v26 }
 0x117   :  { %v401_v61 = vpop.f32.mrf.mxu0  ;;  %v413_v62 = vpop.f32.mrf.mxu1 }
 0x118   :  { %v318_v63 = vadd.f32 %v310_v55, %v286_v59  ;;  %v322_v0 = vadd.f32 %v314_v56, %v302_v60  ;;  %v402_v1 = vadd.f32 %v401_v61, %v400_v57  ;;  %v414_v2 = vadd.f32 %v413_v62, %v412_v58 }
 0x11a   :  { %326 = vst [vmem:[#allocation8 + $0x10] sm:$0xff] %v318_v63  ;;  %330 = vst [vmem:[#allocation8 + $0x30] sm:$0xff] %v322_v0  ;;  %v289_v5 = vadd.f32 %v402_v1, %v350_v26  ;;  %v305_v6 = vadd.f32 %v414_v2, %v350_v26 }
 0x11c   :  { %v319_v7 = vadd.f32 %v311_v3, %v289_v5  ;;  %v323_v8 = vadd.f32 %v315_v4, %v305_v6 }
 0x11e   :  { %327 = vst [vmem:[#allocation8 + $0x18] sm:$0xff] %v319_v7  ;;  %331 = vst [vmem:[#allocation8 + $0x38] sm:$0xff] %v323_v8 }
 0x11f   :  { %538 = shalt.err (!%p535_p5)
}
 0x120   :  { %343 = dma.vmem_to_hbm [thread:$0]  %s338_s7, 1024, %s614_s4, [#allocation4], %s557_s25, %s557_s25, %s558_s26  }
 0x121   :  { %551 = dma.done.wait [#allocation4], 1024  }
 0x122   :  { %552 = vsyncadd [#allocation4], 4294966272 }
 0x123   :  { %347 = vsyncpa [#allocation3], 1 }
 0x124   :  { %348 = vsyncpa [#allocation6], 1 }
 0x125   :  { %349 = vsyncpa [#allocation4], 1 }

</bundles_post_ra>
